<compile_context>
chip_gen: v7x
topology: tpu7x:2x2x1
jax: 0.10.0
libtpu: 0.0.40
codegen_flags: <defaults>
</compile_context>

<pallas_src>
import functools

import jax
import jax.numpy as jnp
from jax.experimental import pallas as pl
from jax.experimental.pallas import tpu as pltpu


def _dice_sums_kernel(x_ref, t_ref, out_ref, acc_ref, *, needs_mask):
    # x_ref block: (1, C, T) float ; t_ref block: (1, 1, T) int
    # out_ref block: (1, 3, C) f32 (same block for all spatial tiles of a sample)
    # acc_ref: VMEM scratch (1, 3, C) f32, persistent across the spatial grid axis.
    k = pl.program_id(1)

    @pl.when(k == 0)
    def _():
        acc_ref[...] = jnp.zeros_like(acc_ref)

    x = x_ref[0].astype(jnp.float32)          # (C, T)
    t = t_ref[0].astype(jnp.int32)            # (1, T)
    C, T = x.shape

    # Softmax over the class axis (sublane reduce on XLU).
    m = jnp.max(x, axis=0, keepdims=True)     # (1, T)
    e = jnp.exp(x - m)                        # (C, T)
    inv = pl.reciprocal(jnp.sum(e, axis=0, keepdims=True))   # one recip per pixel (EUP)
    p = e * inv                               # (C, T)

    if needs_mask:
        # Padded columns carry target == -1: zero their softmax contribution so the
        # per-class probability sums ignore them (intersection / tsum already do,
        # because -1 never matches the class iota).
        p = jnp.where(t >= 0, p, 0.0)

    cls = jax.lax.broadcasted_iota(jnp.int32, (C, T), 0)
    mask = cls == t                           # (C, T) bool, broadcast over classes

    # Spatial (lane-axis) partial reductions for this tile.
    inter = jnp.sum(jnp.where(mask, p, 0.0), axis=1).reshape(1, 1, C)
    psum = jnp.sum(p, axis=1).reshape(1, 1, C)
    tsum = jnp.sum(jnp.where(mask, 1.0, 0.0), axis=1).reshape(1, 1, C)

    acc_ref[:, 0:1, :] += inter
    acc_ref[:, 1:2, :] += psum
    acc_ref[:, 2:3, :] += tsum

    @pl.when(k == pl.num_programs(1) - 1)
    def _():
        out_ref[...] = acc_ref[...]


def _choose_tile_hw(HW, C, x_itemsize, budget_bytes=10 << 20):
    """Pick a lane-dense spatial tile that keeps the per-step working set bounded.

    Working set per grid step ~ 2x double-buffered x block + ~5 live f32 (C, T)
    temporaries + the target row.  10 MiB fits the default scoped-VMEM limit on
    v5e (16 MiB), v6e and v7x (32 MiB); raise the budget (and vmem_limit_bytes)
    on 128-MiB parts if you want wider tiles.
    """
    per_col = C * (2 * x_itemsize + 20) + 8
    tile = max(128, (budget_bytes // per_col) // 128 * 128)
    hw_pad128 = ((HW + 127) // 128) * 128
    return int(min(tile, hw_pad128))


def multiclass_dice_loss(x, target):
    """x: (N, C, H, W) float; target: (N, H, W) integer class indices."""
    N, C, H, W = x.shape
    HW = H * W

    tile = _choose_tile_hw(HW, C, jnp.dtype(x.dtype).itemsize)
    num_k = pl.cdiv(HW, tile)
    HW_pad = num_k * tile
    needs_mask = HW_pad != HW

    x3 = x.reshape(N, C, HW)                      # keep native dtype (bf16 stays bf16)
    t3 = target.reshape(N, 1, HW)
    if not jnp.issubdtype(t3.dtype, jnp.signedinteger):
        t3 = t3.astype(jnp.int32)

    if needs_mask:
        x3 = jnp.pad(x3, ((0, 0), (0, 0), (0, HW_pad - HW)))
        t3 = jnp.pad(t3, ((0, 0), (0, 0), (0, HW_pad - HW)), constant_values=-1)

    kernel = functools.partial(_dice_sums_kernel, needs_mask=needs_mask)
    sums = pl.pallas_call(
        kernel,
        grid=(N, num_k),
        in_specs=[
            pl.BlockSpec((1, C, tile), lambda n, k: (n, 0, k)),
            pl.BlockSpec((1, 1, tile), lambda n, k: (n, 0, k)),
        ],
        out_specs=pl.BlockSpec((1, 3, C), lambda n, k: (n, 0, 0)),
        out_shape=jax.ShapeDtypeStruct((N, 3, C), jnp.float32),
        scratch_shapes=[pltpu.VMEM((1, 3, C), jnp.float32)],
        compiler_params=pltpu.CompilerParams(
            dimension_semantics=("parallel", "arbitrary")),
    )(x3, t3)

    inter = sums[:, 0, :]   # (N, C)
    psum = sums[:, 1, :]
    tsum = sums[:, 2, :]

    smooth = 1e-5
    # per-(n, c) dice, then: loss_c = 1 - mean_n(dice), total = mean_c(loss_c)
    dice = (2.0 * inter + smooth) / (psum + tsum + smooth)
    per_class_loss = 1.0 - jnp.sum(dice, axis=0) / N
    return jnp.sum(per_class_loss) / C


def _reference_loss(x, target):
    # pure-JAX reference mirroring the PyTorch module
    N, C, H, W = x.shape
    p = jax.nn.softmax(x.astype(jnp.float32), axis=1)        # (N,C,H,W)
    onehot = jax.nn.one_hot(target, C, dtype=jnp.float32)    # (N,H,W,C)
    onehot = jnp.transpose(onehot, (0, 3, 1, 2))             # (N,C,H,W)
    smooth = 1e-5
    total = 0.0
    for i in range(C):
        pf = p[:, i].reshape(N, -1)
        tf = onehot[:, i].reshape(N, -1)
        inter = jnp.sum(pf * tf, axis=1)
        dice = (2 * inter + smooth) / (jnp.sum(pf, axis=1) + jnp.sum(tf, axis=1) + smooth)
        total = total + (1.0 - jnp.sum(dice) / N)
    return total / C


if __name__ == "__main__":
    key = jax.random.PRNGKey(0)
    k1, k2, k3, k4 = jax.random.split(key, 4)

    # Case 1: HW is a multiple of the tile (no padding path).
    N, C, H, W = 2, 4, 16, 16
    x = jax.random.normal(k1, (N, C, H, W), dtype=jnp.float32)
    target = jax.random.randint(k2, (N, H, W), 0, C, dtype=jnp.int32)
    loss = jax.block_until_ready(multiclass_dice_loss(x, target))
    ref = jax.block_until_ready(_reference_loss(x, target))
    assert jnp.isfinite(loss), "non-finite loss"
    assert jnp.allclose(loss, ref, atol=2e-5, rtol=2e-5), (loss, ref)

    # Case 2: HW not a multiple of 128 (exercises the masked/padded path).
    N2, C2, H2, W2 = 2, 3, 10, 10
    x2 = jax.random.normal(k3, (N2, C2, H2, W2), dtype=jnp.float32)
    target2 = jax.random.randint(k4, (N2, H2, W2), 0, C2, dtype=jnp.int32)
    loss2 = jax.block_until_ready(multiclass_dice_loss(x2, target2))
    ref2 = jax.block_until_ready(_reference_loss(x2, target2))
    assert jnp.isfinite(loss2), "non-finite loss (padded path)"
    assert jnp.allclose(loss2, ref2, atol=2e-5, rtol=2e-5), (loss2, ref2)

    print("KERNEL_OK")
</pallas_src>

<mosaic_0001>
module attributes {stable_mosaic.version = 11 : i64} {
  func.func @_dice_sums_kernel(%arg0: i32, %arg1: i32, %arg2: memref<1x4x256xf32, #tpu.memory_space<vmem>>, %arg3: memref<1x1x256xi32, #tpu.memory_space<vmem>>, %arg4: memref<1x3x4xf32, #tpu.memory_space<vmem>>, %arg5: memref<1x3x4xf32, #tpu.memory_space<vmem>>) attributes {dimension_semantics = [#tpu.dimension_semantics<parallel>, #tpu.dimension_semantics<arbitrary>], iteration_bounds = array<i64: 2, 1>, scalar_prefetch = 0 : i64, scratch_operands = 1 : i64, tpu.core_type = #tpu.core_type<tc>, window_params = [{transform_indices = @transform_0, window_bounds = array<i64: 1, 4, 256>}, {transform_indices = @transform_1, window_bounds = array<i64: 1, 1, 256>}, {transform_indices = @transform_2, window_bounds = array<i64: 1, 3, 4>}]} {
    %c0_i32 = arith.constant 0 : i32
    %0 = arith.cmpi eq, %arg1, %c0_i32 : i32
    %1 = arith.extui %0 : i1 to i32
    %c0_i32_0 = arith.constant 0 : i32
    %2 = arith.cmpi ne, %1, %c0_i32_0 : i32
    scf.if %2 {
      %cst_31 = arith.constant 0.000000e+00 : f32
      %43 = vector.broadcast %cst_31 : f32 to vector<1x3x4xf32>
      %c0_32 = arith.constant 0 : index
      %c0_33 = arith.constant 0 : index
      %c0_34 = arith.constant 0 : index
      %44 = vector.load %arg5[%c0_32, %c0_33, %c0_34] : memref<1x3x4xf32, #tpu.memory_space<vmem>>, vector<1x3x4xf32>
      tpu.vector_store %arg5[%c0_32, %c0_33, %c0_34], %43 {strides = array<i32>} : memref<1x3x4xf32, #tpu.memory_space<vmem>>, vector<1x3x4xf32>,
    } else {
    }
    %c0 = arith.constant 0 : index
    %c0_1 = arith.constant 0 : index
    %c0_2 = arith.constant 0 : index
    %3 = vector.load %arg2[%c0, %c0_1, %c0_2] : memref<1x4x256xf32, #tpu.memory_space<vmem>>, vector<1x4x256xf32>
    %4 = vector.shape_cast %3 : vector<1x4x256xf32> to vector<4x256xf32>
    %c0_3 = arith.constant 0 : index
    %c0_4 = arith.constant 0 : index
    %c0_5 = arith.constant 0 : index
    %5 = vector.load %arg3[%c0_3, %c0_4, %c0_5] : memref<1x1x256xi32, #tpu.memory_space<vmem>>, vector<1x1x256xi32>
    %6 = vector.shape_cast %5 : vector<1x1x256xi32> to vector<1x256xi32>
    %cst = arith.constant dense<0xFF800000> : vector<256xf32>
    %7 = vector.multi_reduction <maximumf>, %4, %cst [0] : vector<4x256xf32> to vector<256xf32>
    %8 = vector.shape_cast %7 : vector<256xf32> to vector<1x256xf32>
    %9 = vector.broadcast %8 : vector<1x256xf32> to vector<4x256xf32>
    %10 = arith.subf %4, %9 : vector<4x256xf32>
    %11 = math.exp %10 : vector<4x256xf32>
    %cst_6 = arith.constant dense<0.000000e+00> : vector<256xf32>
    %12 = vector.multi_reduction <add>, %11, %cst_6 [0] : vector<4x256xf32> to vector<256xf32>
    %13 = vector.shape_cast %12 : vector<256xf32> to vector<1x256xf32>
    %14 = tpu.reciprocal %13 : vector<1x256xf32> -> vector<1x256xf32>
    %15 = vector.broadcast %14 : vector<1x256xf32> to vector<4x256xf32>
    %16 = arith.mulf %11, %15 : vector<4x256xf32>
    %17 = tpu.iota {dimensions = array<i32: 0>} : vector<4x256xi32>
    %18 = vector.broadcast %6 : vector<1x256xi32> to vector<4x256xi32>
    %19 = arith.cmpi eq, %17, %18 : vector<4x256xi32>
    %cst_7 = arith.constant 0.000000e+00 : f32
    %20 = vector.broadcast %cst_7 : f32 to vector<4x256xf32>
    %21 = arith.select %19, %16, %20 : vector<4x256xi1>, vector<4x256xf32>
    %cst_8 = arith.constant dense<0.000000e+00> : vector<4xf32>
    %22 = vector.multi_reduction <add>, %21, %cst_8 [1] : vector<4x256xf32> to vector<4xf32>
    %23 = vector.shape_cast %22 : vector<4xf32> to vector<1x1x4xf32>
    %cst_9 = arith.constant dense<0.000000e+00> : vector<4xf32>
    %24 = vector.multi_reduction <add>, %16, %cst_9 [1] : vector<4x256xf32> to vector<4xf32>
    %25 = vector.shape_cast %24 : vector<4xf32> to vector<1x1x4xf32>
    %cst_10 = arith.constant 1.000000e+00 : f32
    %cst_11 = arith.constant 0.000000e+00 : f32
    %26 = vector.broadcast %cst_10 : f32 to vector<4x256xf32>
    %27 = vector.broadcast %cst_11 : f32 to vector<4x256xf32>
    %28 = arith.select %19, %26, %27 : vector<4x256xi1>, vector<4x256xf32>
    %cst_12 = arith.constant dense<0.000000e+00> : vector<4xf32>
    %29 = vector.multi_reduction <add>, %28, %cst_12 [1] : vector<4x256xf32> to vector<4xf32>
    %30 = vector.shape_cast %29 : vector<4xf32> to vector<1x1x4xf32>
    %c0_13 = arith.constant 0 : index
    %c0_14 = arith.constant 0 : index
    %c0_15 = arith.constant 0 : index
    %31 = vector.load %arg5[%c0_13, %c0_14, %c0_15] : memref<1x3x4xf32, #tpu.memory_space<vmem>>, vector<1x1x4xf32>
    %32 = arith.addf %31, %23 : vector<1x1x4xf32>
    %c0_16 = arith.constant 0 : index
    %c0_17 = arith.constant 0 : index
    %c0_18 = arith.constant 0 : index
    %33 = vector.load %arg5[%c0_16, %c0_17, %c0_18] : memref<1x3x4xf32, #tpu.memory_space<vmem>>, vector<1x1x4xf32>
    tpu.vector_store %arg5[%c0_16, %c0_17, %c0_18], %32 {strides = array<i32>} : memref<1x3x4xf32, #tpu.memory_space<vmem>>, vector<1x1x4xf32>,
    %c0_19 = arith.constant 0 : index
    %c1 = arith.constant 1 : index
    %c0_20 = arith.constant 0 : index
    %34 = vector.load %arg5[%c0_19, %c1, %c0_20] : memref<1x3x4xf32, #tpu.memory_space<vmem>>, vector<1x1x4xf32>
    %35 = arith.addf %34, %25 : vector<1x1x4xf32>
    %c0_21 = arith.constant 0 : index
    %c1_22 = arith.constant 1 : index
    %c0_23 = arith.constant 0 : index
    %36 = vector.load %arg5[%c0_21, %c1_22, %c0_23] : memref<1x3x4xf32, #tpu.memory_space<vmem>>, vector<1x1x4xf32>
    tpu.vector_store %arg5[%c0_21, %c1_22, %c0_23], %35 {strides = array<i32>} : memref<1x3x4xf32, #tpu.memory_space<vmem>>, vector<1x1x4xf32>,
    %c0_24 = arith.constant 0 : index
    %c2 = arith.constant 2 : index
    %c0_25 = arith.constant 0 : index
    %37 = vector.load %arg5[%c0_24, %c2, %c0_25] : memref<1x3x4xf32, #tpu.memory_space<vmem>>, vector<1x1x4xf32>
    %38 = arith.addf %37, %30 : vector<1x1x4xf32>
    %c0_26 = arith.constant 0 : index
    %c2_27 = arith.constant 2 : index
    %c0_28 = arith.constant 0 : index
    %39 = vector.load %arg5[%c0_26, %c2_27, %c0_28] : memref<1x3x4xf32, #tpu.memory_space<vmem>>, vector<1x1x4xf32>
    tpu.vector_store %arg5[%c0_26, %c2_27, %c0_28], %38 {strides = array<i32>} : memref<1x3x4xf32, #tpu.memory_space<vmem>>, vector<1x1x4xf32>,
    %c0_i32_29 = arith.constant 0 : i32
    %40 = arith.cmpi eq, %arg1, %c0_i32_29 : i32
    %41 = arith.extui %40 : i1 to i32
    %c0_i32_30 = arith.constant 0 : i32
    %42 = arith.cmpi ne, %41, %c0_i32_30 : i32
    scf.if %42 {
      %c0_31 = arith.constant 0 : index
      %c0_32 = arith.constant 0 : index
      %c0_33 = arith.constant 0 : index
      %43 = vector.load %arg5[%c0_31, %c0_32, %c0_33] : memref<1x3x4xf32, #tpu.memory_space<vmem>>, vector<1x3x4xf32>
      %c0_34 = arith.constant 0 : index
      %c0_35 = arith.constant 0 : index
      %c0_36 = arith.constant 0 : index
      %44 = vector.load %arg4[%c0_34, %c0_35, %c0_36] : memref<1x3x4xf32, #tpu.memory_space<vmem>>, vector<1x3x4xf32>
      tpu.vector_store %arg4[%c0_34, %c0_35, %c0_36], %43 {strides = array<i32>} : memref<1x3x4xf32, #tpu.memory_space<vmem>>, vector<1x3x4xf32>,
    } else {
    }
    return
  }
  func.func @transform_0(%arg0: i32, %arg1: i32) -> (i32, i32, i32) {
    %c0_i32 = arith.constant 0 : i32
    %c0_i32_0 = arith.constant 0 : i32
    return %arg0, %c0_i32, %arg1 : i32, i32, i32
  }
  func.func @transform_1(%arg0: i32, %arg1: i32) -> (i32, i32, i32) {
    %c0_i32 = arith.constant 0 : i32
    %c0_i32_0 = arith.constant 0 : i32
    return %arg0, %c0_i32, %arg1 : i32, i32, i32
  }
  func.func @transform_2(%arg0: i32, %arg1: i32) -> (i32, i32, i32) {
    %c0_i32 = arith.constant 0 : i32
    %c0_i32_0 = arith.constant 0 : i32
    %c0_i32_1 = arith.constant 0 : i32
    return %arg0, %c0_i32, %c0_i32_0 : i32, i32, i32
  }
}

</mosaic_0001>

<bundles_post_ra>
// kernel: tpu_custom_call.1
= control target key start
LH: loop header
LB: loop body
LE: loop exit
PB: predicated region body
PF: predicated region fallthrough
CT: control target
= control target key end

     0   :  { %7 = vsyncpa [#allocation4], 0  ;;  %s867_s0 = inlined_call_operand.hbm [shape: f32[2,4,256], index: 0, kind: input, shape index: {}]   ;;  %s868_s1 = inlined_call_operand.hbm [shape: s32[2,1,256], index: 1, kind: input, shape index: {}]   ;;  %s869_s2 = inlined_call_operand.vmem [shape: f32[2,3,4], index: 2, kind: output, shape index: {}]  }
   0x1   :  { %9 = vsyncpa [#allocation4 + $0x1], 0 }
   0x2   :  { %10 = vsyncpa [#allocation6], 0 }
   0x3   :  { %12 = vsyncpa [#allocation6 + $0x1], 0  ;;  %s669_s9 = smov 0   ;;  %s671_s10 = smov 0  }
   0x4   :  { %s673_s11 = smov 0   ;;  %s675_s12 = smov 0  }
   0x5   :  { %s677_s13 = smov 0   ;;  %s679_s14 = smov 0  }
   0x6 LB: > { %s449_s15 = sadd.s32 4294967295, %s649_s14   ;;  %s30_s16 = sadd.s32 1, %s645_s13  ;;  %s649_s14 = sphi %s679_s14, %s18_s14   ;;  %s645_s13 = sphi %s677_s13, %s883_s13   ;;  %s641_s12 = sphi %s675_s12, %s882_s12   ;;  %s637_s11 = sphi %s673_s11, %s881_s11   ;;  %s633_s10 = sphi %s671_s10, %s880_s10   ;;  %s629_s9 = sphi %s669_s9, %s879_s9  }
   0x7   : > { %p32_p0 = scmp.ge.s32.totalorder %s30_s16, 2  ;;  %s39_s17 = sadd.s32 1, %s637_s11 }
   0x8   : > { %p46_p1 = scmp.ne.s32.totalorder %s637_s11, %s633_s10  ;;  %p47_p2 = scmp.eq.s32.totalorder %s649_s14, 0 }
   0x9   : > { %s885_s16 = smov (%p32_p0, %s30_s16), 0  ;;  %p52_p4 = scmp.ne.s32.totalorder %s633_s10, %s629_s9 }
   0xa   : > { %p705_p3 = por %p47_p2, %p46_p1  ;;  %s34_s19 = ssub.s32 %s645_s13, %s885_s16 }
   0xb   : > { %p53_p5 = scmp.eq.s32.totalorder %s449_s15, 0  ;;  %p37_p6 = scmp.eq.s32.totalorder %s34_s19, 0 }
   0xc   : > { %p478_p8 = scmp.lt.s32.totalorder %s649_s14, 2  ;;  %s721_s22 = sand.u32 1, %s637_s11  }
   0xd   : > { %p712_p7 = por %p53_p5, %p52_p4  ;;  %s465_s23 = sshll.u32 %s645_s13, 7 }
   0xe   : > { %s718_s21 = scalar_select %p37_p6, %s637_s11, %s39_s17  }
   0xf   : > { %s872_s20 = scalar_select %p712_p7, 1, 0 }
  0x10   : > { %s453_s24 = sshll.u32 %s721_s22, 3  ;;  %s728_s27 = scalar_lea.hbm %s867_s0, %s465_s23 }
  0x11   : > { %s134_s28 = scalar_lea.vmem [#allocation3], %s453_s24  ;;  %p732_p9 = pnand %p478_p8, %p705_p3 }
  0x12   : > { %s144_s29 = sshll.u32 %s134_s28, 4  ;;  %s131_s3 = scalar_lea.sflag [#allocation4], %s721_s22  ;;  %s736_s29 = int_to_ptr.vmem [resolvable:$true] %s144_s29 }
  0x13   : > { %s535_s4 = scalar_lea.hbm %s728_s27, 128  ;;  %p537_p13 = pneg %p732_p9 }
  0x14   : > { %p536_p12 = scmp.ne.s32.totalorder %s728_s27, %s535_s4  ;;  %s540_s7 = scalar_lea.hbm %s867_s0, 256 }
  0x15   : > { %p541_p2 = scmp.lt.u32.totalorder %s728_s27, %s867_s0  ;;  %p542_p3 = scmp.lt.u32.totalorder %s540_s7, %s535_s4 }
  0x16   : > { %p538_p0 = pnand %p537_p13, %p536_p12  ;;  %p544_p5 = scmp.lt.u32.totalorder %s535_s4, %s728_s27 }
  0x17   : > { %p543_p4 = por %p542_p3, %p541_p2 }
  0x18   : > { %p539_p1 = pneg %p538_p0 }
  0x19   : > { %p545_p6 = por %p544_p5, %p543_p4 }
  0x1b   : > { %p546_p8 = pnand %p545_p6, %p539_p1 }
  0x1d   : > { %549 = shalt.err (!%p546_p8)
}
  0x1e   : > { %s550_s15 = scalar_lea.vmem %s736_s29, 128  ;;  %s651_s17 = smov [#allocation3]  }
  0x1f   : > { %p551_p12 = scmp.ne.s32.totalorder %s736_s29, %s550_s15  ;;  %s555_s18 = sshll.u32 %s651_s17, 4  ;;  %s556_s18 = int_to_ptr.vmem [resolvable:$false] %s555_s18 }
  0x20   : > { %s557_s19 = scalar_lea.vmem %s556_s18, 256  ;;  %p558_p11 = scmp.lt.s32.totalorder %s736_s29, %s556_s18 }
  0x21   : > { %p553_p0 = pnand %p551_p12, %p537_p13  ;;  %p559_p2 = scmp.lt.s32.totalorder %s557_s19, %s550_s15 }
  0x23   : > { %p554_p10 = pneg %p553_p0  ;;  %p560_p3 = por %p559_p2, %p558_p11 }
  0x25   : > { %p561_p4 = pnand %p560_p3, %p554_p10 }
  0x27   : > { %564 = shalt.err (!%p561_p4)
}
  0x28   : > { %474 = dma.hbm_to_vmem [thread:$0]  (!%p732_p9), %s728_s27, 128, %s736_s29, %s131_s3  }
  0x29   : > { %p874_p1 = scmp.lt.s32.totalorder %s649_s14, 3  ;;  %p875_p5 = scmp.ge.s32.totalorder %s649_s14, 1 }
  0x2a   : > { %s456_s24 = sshll.u32 %s721_s22, 1  ;;  %s466_s25 = sshll.u32 %s645_s13, 5 }
  0x2b   : > { %p770_p6 = pnand %p875_p5, %p874_p1  ;;  %s779_s4 = scalar_lea.hbm %s868_s1, %s466_s25 }
  0x2c   : > { %s155_s5 = scalar_lea.vmem [#allocation5], %s456_s24  ;;  %s152_s27 = scalar_lea.sflag [#allocation6], %s721_s22 }
  0x2d   : > { %s876_s23 = scalar_select %p770_p6, 1, 0 }
  0x2e   : > { %s165_s6 = sshll.u32 %s155_s5, 4  ;;  %s565_s29 = scalar_lea.hbm %s779_s4, 32  ;;  %s166_s6 = int_to_ptr.vmem [resolvable:$true] %s165_s6 }
  0x2f   : > { %p566_p10 = scmp.ne.s32.totalorder %s779_s4, %s565_s29  ;;  %s570_s8 = scalar_lea.hbm %s868_s1, 64 }
  0x30   : > { %p571_p12 = scmp.lt.u32.totalorder %s779_s4, %s868_s1  ;;  %p572_p0 = scmp.lt.u32.totalorder %s570_s8, %s565_s29 }
  0x31   : > { %p568_p11 = pnand %p566_p10, %p537_p13  ;;  %p574_p3 = scmp.lt.u32.totalorder %s565_s29, %s779_s4 }
  0x32   : > { %p573_p2 = por %p572_p0, %p571_p12 }
  0x33   : > { %p569_p8 = pneg %p568_p11 }
  0x34   : > { %p575_p4 = por %p574_p3, %p573_p2 }
  0x36   : > { %p576_p1 = pnand %p575_p4, %p569_p8 }
  0x38   : > { %579 = shalt.err (!%p576_p1)
}
  0x39   : > { %s580_s22 = scalar_lea.vmem %s166_s6, 32  ;;  %s652_s17 = smov [#allocation5]  }
  0x3a   : > { %p581_p5 = scmp.ne.s32.totalorder %s166_s6, %s580_s22  ;;  %s585_s18 = sshll.u32 %s652_s17, 4  ;;  %s586_s18 = int_to_ptr.vmem [resolvable:$false] %s585_s18 }
  0x3b   : > { %s587_s19 = scalar_lea.vmem %s586_s18, 64  ;;  %p588_p7 = scmp.lt.s32.totalorder %s166_s6, %s586_s18 }
  0x3c   : > { %p583_p10 = pnand %p581_p5, %p537_p13  ;;  %p589_p6 = scmp.lt.s32.totalorder %s587_s19, %s580_s22 }
  0x3e   : > { %p584_p11 = pneg %p583_p10  ;;  %p590_p0 = por %p589_p6, %p588_p7 }
  0x40   : > { %p591_p12 = pnand %p590_p0, %p584_p11 }
  0x42   : > { %594 = shalt.err (!%p591_p12)
}
  0x43   : > { %477 = dma.hbm_to_vmem [thread:$0]  (!%p732_p9), %s779_s4, 32, %s166_s6, %s152_s27  }
  0x44   : > { %p877_p8 = scmp.ne.s32.totalorder %s876_s23, 0 }
  0x45   : > { %s176_s24 = sand.u32 (!%p877_p8), 1, %s633_s10   ;;  %p878_p13 = scmp.ne.s32.totalorder (!%p877_p8), %s872_s20, 0 }
  0x46   : > { %174 = sbr.rel (%p877_p8) target bundleno = 310 (0x136), region = 28  ;;  %s460_s25 = sshll.u32 (!%p877_p8), %s176_s24, 3 }
  0x47   : > { %s177_s26 = scalar_lea.sflag (!%p877_p8), [#allocation4], %s176_s24  ;;  %s180_s28 = scalar_lea.vmem (!%p877_p8), [#allocation3], %s460_s25 }
  0x4d   : > { %620 = dma.done.wait (%p878_p13), %s177_s26, 128  }
  0x4e   : > { %622 = vsyncadd (%p878_p13), %s177_s26, 4294967168  ;;  %s461_s5 = sshll.u32 %s176_s24, 1  ;;  %s186_s29 = scalar_lea.sflag [#allocation6], %s176_s24 }
  0x4f   : > { %s189_s30 = scalar_lea.vmem [#allocation5], %s461_s5 }
  0x50   : > { %624 = dma.done.wait (%p878_p13), %s186_s29, 32  }
  0x51   : > { %626 = vsyncadd (%p878_p13), %s186_s29, 4294967264  ;;  %v277_v0 = vlaneseq  ;;  %vm224_vm0 = vcmask 26624   ;;  %v653_v1 = vmov 0.0   ;;  %vm231_vm1 = vcmask 1043456   ;;  %v226_v7 = vld [vmem:[%s180_s28] sm:$0xff]  ;;  %p216_p7 = scmp.lt.s32.totalorder %s641_s12, 1 }
  0x52   : > { %225 = vst.msk [vmem:[#allocation2] sm:$0x7] %vm224_vm0, %v653_v1  ;;  %v227_v8 = vld [vmem:[%s189_s30] sm:$0x3]  ;;  %v229_v9 = vcombine.high %v226_v7, %v226_v7  ;;  %v232_v10 = vsel %vm231_vm1, %v226_v7, -inf  ;;  %vm321_vm4 = vcmask 24576  }
  0x53   : > { %v813_v2 = vshrl.u32 %v277_v0, 7  ;;  %v314_v3 = vand.u32 127, %v277_v0  ;;  %v233_v13 = vrot.slane %v232_v10, 4  ;;  %s887_s12 = smov (!%p216_p7, %s641_s12), 1 }
  0x54   : > { %v239_v14 = vsel %vm231_vm1, %v229_v9, -inf  ;;  %s462_s20 = sshll.u32 %s887_s12, 2 }
  0x55   : > { %v281_v4 = vsub.s32 0, %v813_v2  ;;  %v285_v5 = vsub.s32 1, %v813_v2  ;;  %v818_v6 = vsub.s32 %v314_v3, %v813_v2  ;;  %v234_v15 = vmax.f32 %v232_v10, %v233_v13  ;;  %s219_s6 = scalar_lea.vmem %s869_s2, %s462_s20 }
  0x56   : > { %v240_v16 = vrot.slane %v239_v14, 4 }
  0x57   : > { %v282_v11 = vrot.slane %v227_v8, %v281_v4  ;;  %v286_v12 = vrot.slane %v227_v8, %v285_v5  ;;  %v235_v21 = vrot.slane %v234_v15, 2 }
  0x58   : > { %v241_v22 = vmax.f32 %v239_v14, %v240_v16 }
  0x59   : > { %vm287_vm2 = vcmp.eq.s32.totalorder %v813_v2, %v282_v11  ;;  %vm288_vm3 = vcmp.eq.s32.totalorder %v813_v2, %v286_v12  ;;  %v236_v24 = vmax.f32 %v234_v15, %v235_v21  ;;  %v332_v0 = vld [vmem:[#allocation2 + $0x2] sm:$0x1]  ;;  %v311_v4 = vld [vmem:[#allocation2] sm:$0x1]  ;;  %v323_v9 = vld [vmem:[#allocation2 + $0x1] sm:$0x1] }
  0x5a   : > { %v304_v17 = vsel %vm287_vm2, 1.0, %v653_v1  ;;  %v305_v18 = vsel %vm288_vm3, 1.0, %v653_v1  ;;  %v242_v25 = vrot.slane %v241_v22, 2 }
  0x5b   : > { %v306_v19 = vsel %vm231_vm1, %v304_v17, 0.0  ;;  %v307_v20 = vsel %vm231_vm1, %v305_v18, 0.0  ;;  %v237_v26 = vrot.slane %v236_v24, 1 }
  0x5c   : > { %v308_v23 = vadd.f32 %v307_v20, %v306_v19  ;;  %v243_v27 = vmax.f32 %v241_v22, %v242_v25 }
  0x5d   : > { %v238_v28 = vmax.f32 %v236_v24, %v237_v26 }
  0x5e   : > { %309 = vadd.xlane.f32.xlu1 %v308_v23  ;;  %v244_v29 = vrot.slane %v243_v27, 1 }
  0x60   : > { %v245_v30 = vmax.f32 %v243_v27, %v244_v29 }
  0x62   : > { %v248_v31 = vcombine.low %v238_v28, %v245_v30 }
  0x64   : > { %v250_v32 = vsub.f32 %v226_v7, %v248_v31 }
  0x66   : > { %v251_v33 = vmul.f32 1.442695, %v250_v32 }
  0x68   : > { %529 = vpow2.f32 %v251_v33 }
  0x72   : > { %v530_v34 = vpop.eup %529 }
  0x73   : > { %v254_v35 = vcombine.high %v530_v34, %v530_v34  ;;  %v256_v36 = vsel %vm231_vm1, %v530_v34, 0.0 }
  0x74   : > { %v257_v37 = vrot.slane %v256_v36, 4 }
  0x75   : > { %v263_v38 = vsel %vm231_vm1, %v254_v35, 0.0 }
  0x76   : > { %v258_v39 = vadd.f32 %v257_v37, %v256_v36  ;;  %v264_v40 = vrot.slane %v263_v38, 4 }
  0x78   : > { %v259_v41 = vrot.slane %v258_v39, 2  ;;  %v265_v42 = vadd.f32 %v264_v40, %v263_v38 }
  0x7a   : > { %v260_v43 = vadd.f32 %v259_v41, %v258_v39  ;;  %v266_v44 = vrot.slane %v265_v42, 2 }
  0x7c   : > { %v261_v45 = vrot.slane %v260_v43, 1  ;;  %v267_v46 = vadd.f32 %v266_v44, %v265_v42 }
  0x7e   : > { %v262_v47 = vadd.f32 %v261_v45, %v260_v43  ;;  %v268_v48 = vrot.slane %v267_v46, 1 }
  0x80   : > { %v269_v49 = vadd.f32 %v268_v48, %v267_v46  ;;  %531 = vrcp.f32 %v262_v47 }
  0x82   : > { %533 = vrcp.f32 %v269_v49 }
  0x8a   : > { %v532_v50 = vpop.eup %531 }
  0x8c   : > { %v534_v51 = vpop.eup %533 }
  0x8d   : > { %v274_v52 = vcombine.low %v532_v50, %v534_v51 }
  0x8f   : > { %v276_v53 = vmul.f32 %v530_v34, %v274_v52 }
  0x91   : > { %v290_v54 = vcombine.high %v276_v53, %v276_v53  ;;  %v292_v55 = vsel %vm287_vm2, %v276_v53, 0.0  ;;  %v299_v59 = vsel %vm231_vm1, %v276_v53, 0.0 }
  0x92   : > { %v294_v56 = vsel %vm231_vm1, %v292_v55, 0.0 }
  0x93   : > { %v293_v57 = vsel %vm288_vm3, %v290_v54, 0.0  ;;  %v300_v60 = vsel %vm231_vm1, %v290_v54, 0.0 }
  0x94   : > { %v295_v58 = vsel %vm231_vm1, %v293_v57, 0.0  ;;  %v301_v62 = vadd.f32 %v300_v60, %v299_v59 }
  0x95   : > { %v296_v61 = vadd.f32 %v295_v58, %v294_v56 }
  0x97   : > { %297 = vadd.xlane.f32.xlu0 %v296_v61 }
  0x9b   : > { %302 = vadd.xlane.f32.xlu0 %v301_v62 }
  0xeb   : > { %v310_v63 = vpop.xlane.xlu1 %309 }
  0xec   : > { %v337_v1 = vrot.slane %v310_v63, %v818_v6 }
  0xee   : > { %v339_v3 = vadd.f32 %v337_v1, %v332_v0 }
  0xf0   : > { %340 = vst.msk [vmem:[#allocation2 + $0x2] sm:$0x1] %vm321_vm4, %v339_v3 }
 0x124   : > { %v298_v2 = vpop.xlane.xlu0 %297 }
 0x125   : > { %v318_v5 = vrot.slane %v298_v2, %v818_v6 }
 0x127   : > { %v320_v7 = vadd.f32 %v318_v5, %v311_v4 }
 0x128   : > { %v303_v8 = vpop.xlane.xlu0 %302 }
 0x129   : > { %322 = vst.msk [vmem:[#allocation2] sm:$0x1] %vm321_vm4, %v320_v7  ;;  %v328_v10 = vrot.slane %v303_v8, %v818_v6 }
 0x12b   : > { %v330_v11 = vadd.f32 %v328_v10, %v323_v9 }
 0x12d   : > { %331 = vst.msk [vmem:[#allocation2 + $0x1] sm:$0x1] %vm321_vm4, %v330_v11 }
 0x134   : > { %v344_v12 = vld [vmem:[#allocation2] sm:$0x7] }
 0x135   : > { %346 = vst.msk [vmem:[%s219_s6] sm:$0x7] %vm224_vm0, %v344_v12 }
 0x136 PF: > { %s18_s14 = sadd.s32 1, %s649_s14   ;;  %s879_s9 = smov %s633_s10 }
 0x137   : > { %p15_p9 = scmp.ge.s32.totalorder %s18_s14, 4   ;;  %s880_s10 = smov %s637_s11 }
 0x138   : > { %s881_s11 = smov %s718_s21  ;;  %s882_s12 = smov %s645_s13 }
 0x139   : > { %s883_s13 = smov %s885_s16  ;;  %17 = sbr.rel (!%p15_p9) target bundleno = 6 (0x6), region = 89 }
 0x140   :  { %366 = vsyncpa [#allocation4], 1 }
 0x141   :  { %368 = vsyncpa [#allocation4 + $0x1], 1 }
 0x142   :  { %369 = vsyncpa [#allocation6], 1 }
 0x143   :  { %371 = vsyncpa [#allocation6 + $0x1], 1 }

</bundles_post_ra>
